<compile_context>
chip_gen: v7x
topology: tpu7x:2x2x1
jax: 0.10.0
libtpu: 0.0.40
codegen_flags: <defaults>
</compile_context>

<pallas_src>
import functools

import jax
import jax.numpy as jnp
import numpy as np
from jax.experimental import pallas as pl
from jax.experimental.pallas import tpu as pltpu


def _spatial_attn_kernel(normalize_attn, inv_hw, w_ref, l_ref, c_ref, g_ref,
                         m_ref, s_ref, acc_ref):
    """Processes one (TB, C, HWT) slab; accumulates g over the H*W grid axis.

    w_ref   : (1, C)        1x1 conv weight (C->1, no bias), in l's dtype
    l_ref   : (TB, C, HWT)  input slab, native dtype (lane-dense H*W tile)
    c_ref   : (TB, 1, HWT)  raw attention-logit output tile
    g_ref   : (TB, 1, C)    pooled / gated feature output (written on last HW step)
    m_ref   : (TB, 1, 1)    f32 scratch: running max (softmax branch)
    s_ref   : (TB, 1, 1)    f32 scratch: running softmax denominator
    acc_ref : (TB, 1, C)    f32 scratch: running gated-feature accumulator
    """
    hw_i = pl.program_id(1)
    last_hw = pl.num_programs(1) - 1

    l = l_ref[...]                                               # no f32 upcast
    tb, ch = l.shape[0], l.shape[1]
    w = jnp.broadcast_to(w_ref[...][None], (tb, 1, ch))          # (TB, 1, C)

    # 1x1 conv (C -> 1): batched (1,C) @ (C,HWT) matmul, f32 accumulation.
    c = jnp.einsum("bkc,bch->bkh", w, l,
                   preferred_element_type=jnp.float32)           # (TB,1,HWT) f32
    c_ref[...] = c.astype(c_ref.dtype)

    if normalize_attn:
        # Online softmax over the (tiled) H*W axis + weighted-sum pooling.
        @pl.when(hw_i == 0)
        def _():
            m_ref[...] = jnp.full_like(m_ref, -jnp.inf)
            s_ref[...] = jnp.zeros_like(s_ref)
            acc_ref[...] = jnp.zeros_like(acc_ref)

        m_prev = m_ref[...]                                      # (TB,1,1)
        m_new = jnp.maximum(m_prev, jnp.max(c, axis=2, keepdims=True))
        alpha = jnp.exp(m_prev - m_new)                          # (TB,1,1)
        p = jnp.exp(c - m_new)                                   # (TB,1,HWT) f32
        s_ref[...] = alpha * s_ref[...] + jnp.sum(p, axis=2, keepdims=True)
        # Gated pooling: fold the attention multiply into the matmul MACs.
        # (p stays f32 when the input is f32 — see review correctness note.)
        part = jnp.einsum("bkh,bch->bkc", p.astype(l.dtype), l,
                          preferred_element_type=jnp.float32)    # (TB,1,C)
        acc_ref[...] = alpha * acc_ref[...] + part
        m_ref[...] = m_new

        @pl.when(hw_i == last_hw)
        def _():
            g_ref[...] = (acc_ref[...] / s_ref[...]).astype(g_ref.dtype)
    else:
        @pl.when(hw_i == 0)
        def _():
            acc_ref[...] = jnp.zeros_like(acc_ref)

        a = jax.nn.sigmoid(c)                                    # (TB,1,HWT) f32
        acc_ref[...] += jnp.einsum("bkh,bch->bkc", a.astype(l.dtype), l,
                                   preferred_element_type=jnp.float32)

        @pl.when(hw_i == last_hw)
        def _():
            g_ref[...] = (acc_ref[...] * inv_hw).astype(g_ref.dtype)


def _kernel_vmem_bytes(tb, c, hwt, itemsize):
    """Working-set estimate: double-buffered pipeline blocks + f32 temps + scratch."""
    l_blk = tb * c * hwt * itemsize
    c_blk = tb * hwt * itemsize
    g_blk = tb * c * itemsize
    f32 = 4
    temps = 2 * tb * hwt * f32            # f32 logits + exp/sigmoid temporary
    scratch = tb * (c + 2) * f32          # acc + running max + running denom
    return 2 * (l_blk + c_blk + g_blk) + temps + scratch


def _choose_tiles(n, c, hw, itemsize, budget_bytes, max_hw_tile=None):
    """Pick (batch_tile, hw_tile).

    * hw_tile is HW itself or a 128-multiple divisor of HW (satisfies the
      (8,128) tiling rule and covers the grid exactly -> no ragged edge blocks).
    * batch_tile divides N (no wrapper-side pad) and is capped at N//2 when
      N > 1 so the "parallel" grid axis has >= 2 steps (v7x megacore).
    * prefer the largest hw_tile, then the largest batch_tile, that keeps the
      estimated working set within budget_bytes.
    """
    hw_cands = [hw] + sorted((d for d in range(128, hw, 128) if hw % d == 0),
                             reverse=True)
    if max_hw_tile is not None:
        hw_cands = [t for t in hw_cands if t <= max_hw_tile] or [hw_cands[-1]]
    cap = n if n == 1 else max(1, n // 2)
    tb_cands = sorted((d for d in range(1, cap + 1) if n % d == 0), reverse=True)
    for hwt in hw_cands:
        for tb in tb_cands:
            if _kernel_vmem_bytes(tb, c, hwt, itemsize) <= budget_bytes:
                return tb, hwt
    return 1, hw_cands[-1]    # smallest legal tile (C is never split)


def spatial_attn(l, conv_weight, *, normalize_attn=False,
                 vmem_limit_bytes=32 << 20, max_hw_tile=None):
    """Pallas implementation of SpatialAttn.forward.

    l           : (N, C, H, W) float32 / bfloat16
    conv_weight : (1, C, 1, 1)  (nn.Conv2d(C, 1, 1, bias=False).weight)
    returns     : (c, g) with c: (N, 1, H, W), g: (N, C)
    """
    N, C, H, W = l.shape
    HW = H * W
    out_dtype = l.dtype

    # Lane-dense layout: flatten H,W into the last dim (free reshape in XLA).
    l3 = l.reshape(N, C, HW)
    w = conv_weight.reshape(1, C).astype(l.dtype)   # tiny; matmul in l's dtype

    # ~70% of the scoped VMEM limit for the pipeline working set (headroom for
    # compiler-internal scratch); 32 MiB default is safe on v5e/v6e/v7x.
    budget = int(vmem_limit_bytes * 0.7)
    tb, hwt = _choose_tiles(N, C, HW, l.dtype.itemsize, budget, max_hw_tile)

    kernel = functools.partial(_spatial_attn_kernel, normalize_attn,
                               1.0 / float(HW))

    c_out, g_out = pl.pallas_call(
        kernel,
        out_shape=(
            jax.ShapeDtypeStruct((N, 1, HW), out_dtype),
            jax.ShapeDtypeStruct((N, 1, C), out_dtype),
        ),
        grid_spec=pltpu.PrefetchScalarGridSpec(
            num_scalar_prefetch=0,
            grid=(N // tb, HW // hwt),                  # (parallel, reduction)
            in_specs=[
                pl.BlockSpec((1, C), lambda b, h: (0, 0)),           # weight
                pl.BlockSpec((tb, C, hwt), lambda b, h: (b, 0, h)),  # input slab
            ],
            out_specs=[
                pl.BlockSpec((tb, 1, hwt), lambda b, h: (b, 0, h)),  # logits c
                pl.BlockSpec((tb, 1, C), lambda b, h: (b, 0, 0)),    # pooled g
            ],
            scratch_shapes=[
                pltpu.VMEM((tb, 1, 1), jnp.float32),   # running max (softmax)
                pltpu.VMEM((tb, 1, 1), jnp.float32),   # running denominator
                pltpu.VMEM((tb, 1, C), jnp.float32),   # g accumulator
            ],
        ),
        compiler_params=pltpu.CompilerParams(
            dimension_semantics=("parallel", "arbitrary"),
            vmem_limit_bytes=vmem_limit_bytes,
        ),
    )(w, l3)

    return c_out.reshape(N, 1, H, W), g_out.reshape(N, C)


def _reference(l, conv_weight, normalize_attn=False):
    """Pure-JAX reference mirroring the PyTorch forward (exact f32, no MXU dots)."""
    N, C, H, W = l.shape
    lf = l.astype(jnp.float32)
    w = conv_weight.reshape(1, C, 1, 1).astype(jnp.float32)
    c = jnp.sum(lf * w, axis=1, keepdims=True)               # (N,1,H,W)
    if normalize_attn:
        a = jax.nn.softmax(c.reshape(N, 1, -1), axis=2).reshape(N, 1, H, W)
        g = (a * lf).reshape(N, C, -1).sum(axis=2)
    else:
        a = jax.nn.sigmoid(c)
        g = (a * lf).mean(axis=(2, 3))
    return c, g


if __name__ == "__main__":
    # Small shapes consistent with the module default: in_features=8 channels.
    N, C, H, W = 2, 8, 16, 16

    key = jax.random.PRNGKey(0)
    k_l, k_w = jax.random.split(key)
    l = jax.random.normal(k_l, (N, C, H, W), dtype=jnp.float32)
    # Deterministic conv weight init (kaiming-ish scale for a 1x1 conv, C fan-in).
    conv_weight = (jax.random.normal(k_w, (1, C, 1, 1), dtype=jnp.float32)
                   / jnp.sqrt(jnp.float32(C)))

    # MXU f32 matmuls may execute at bf16-pass precision depending on the
    # generation / default dot precision; 5e-3 covers that worst case while
    # still catching any indexing / accumulation bug (values are O(1)).
    tol = dict(rtol=5e-3, atol=5e-3)

    # Default branch (sigmoid + mean pool) and softmax branch, auto-chosen tiles.
    for norm in (False, True):
        c_out, g_out = spatial_attn(l, conv_weight, normalize_attn=norm)
        jax.block_until_ready((c_out, g_out))
        c_ref, g_ref = _reference(l, conv_weight, normalize_attn=norm)
        assert c_out.shape == (N, 1, H, W) and g_out.shape == (N, C)
        np.testing.assert_allclose(np.asarray(c_out), np.asarray(c_ref), **tol)
        np.testing.assert_allclose(np.asarray(g_out), np.asarray(g_ref), **tol)

    # Exercise the multi-step H*W reduction path (pl.when accumulator init /
    # finalize and the online softmax) by forcing a 128-wide spatial tile.
    for norm in (False, True):
        c_out, g_out = spatial_attn(l, conv_weight, normalize_attn=norm,
                                    max_hw_tile=128)
        jax.block_until_ready((c_out, g_out))
        c_ref, g_ref = _reference(l, conv_weight, normalize_attn=norm)
        np.testing.assert_allclose(np.asarray(c_out), np.asarray(c_ref), **tol)
        np.testing.assert_allclose(np.asarray(g_out), np.asarray(g_ref), **tol)

    print("KERNEL_OK")
</pallas_src>

<mosaic_0001>
module attributes {stable_mosaic.version = 11 : i64} {
  func.func @_spatial_attn_kernel(%arg0: i32, %arg1: i32, %arg2: memref<1x8xf32, #tpu.memory_space<vmem>>, %arg3: memref<1x8x256xf32, #tpu.memory_space<vmem>>, %arg4: memref<1x1x256xf32, #tpu.memory_space<vmem>>, %arg5: memref<1x1x8xf32, #tpu.memory_space<vmem>>, %arg6: memref<1x1x1xf32, #tpu.memory_space<vmem>>, %arg7: memref<1x1x1xf32, #tpu.memory_space<vmem>>, %arg8: memref<1x1x8xf32, #tpu.memory_space<vmem>>) attributes {dimension_semantics = [#tpu.dimension_semantics<parallel>, #tpu.dimension_semantics<arbitrary>], iteration_bounds = array<i64: 2, 1>, scalar_prefetch = 0 : i64, scratch_operands = 3 : i64, tpu.core_type = #tpu.core_type<tc>, window_params = [{pipeline_mode = #tpu.pipeline_mode<synchronous>, transform_indices = @transform_0, window_bounds = array<i64: 1, 8>}, {transform_indices = @transform_1, window_bounds = array<i64: 1, 8, 256>}, {transform_indices = @transform_2, window_bounds = array<i64: 1, 1, 256>}, {transform_indices = @transform_3, window_bounds = array<i64: 1, 1, 8>}]} {
    %c0 = arith.constant 0 : index
    %c0_0 = arith.constant 0 : index
    %c0_1 = arith.constant 0 : index
    %0 = vector.load %arg3[%c0, %c0_0, %c0_1] : memref<1x8x256xf32, #tpu.memory_space<vmem>>, vector<1x8x256xf32>
    %c0_2 = arith.constant 0 : index
    %c0_3 = arith.constant 0 : index
    %1 = vector.load %arg2[%c0_2, %c0_3] : memref<1x8xf32, #tpu.memory_space<vmem>>, vector<1x8xf32>
    %2 = vector.shape_cast %1 : vector<1x8xf32> to vector<1x1x8xf32>
    "tpu.trace_start"() <{level = 10 : i32, message = "bkc,bch->bkh"}> : () -> ()
    %cst = arith.constant dense<0.000000e+00> : vector<1x1x256xf32>
    %3 = tpu.matmul %2, %0, %cst {dimension_numbers = #tpu.dot_dimension_numbers<[2], [1], [1], [2], [0, 0, 0, 1, 1, 2], [0], [0]>} : vector<1x1x8xf32>, vector<1x8x256xf32>, vector<1x1x256xf32> -> vector<1x1x256xf32>
    "tpu.trace_stop"() : () -> ()
    %c0_4 = arith.constant 0 : index
    %c0_5 = arith.constant 0 : index
    %c0_6 = arith.constant 0 : index
    %4 = vector.load %arg4[%c0_4, %c0_5, %c0_6] : memref<1x1x256xf32, #tpu.memory_space<vmem>>, vector<1x1x256xf32>
    tpu.vector_store %arg4[%c0_4, %c0_5, %c0_6], %3 {strides = array<i32>} : memref<1x1x256xf32, #tpu.memory_space<vmem>>, vector<1x1x256xf32>,
    %c0_i32 = arith.constant 0 : i32
    %5 = arith.cmpi eq, %arg1, %c0_i32 : i32
    %6 = arith.extui %5 : i1 to i32
    %c0_i32_7 = arith.constant 0 : i32
    %7 = arith.cmpi ne, %6, %c0_i32_7 : i32
    scf.if %7 {
      %cst_18 = arith.constant 0.000000e+00 : f32
      %20 = vector.broadcast %cst_18 : f32 to vector<1x1x8xf32>
      %c0_19 = arith.constant 0 : index
      %c0_20 = arith.constant 0 : index
      %c0_21 = arith.constant 0 : index
      %21 = vector.load %arg8[%c0_19, %c0_20, %c0_21] : memref<1x1x8xf32, #tpu.memory_space<vmem>>, vector<1x1x8xf32>
      tpu.vector_store %arg8[%c0_19, %c0_20, %c0_21], %20 {strides = array<i32>} : memref<1x1x8xf32, #tpu.memory_space<vmem>>, vector<1x1x8xf32>,
    } else {
    }
    %8 = arith.negf %3 : vector<1x1x256xf32>
    %9 = math.exp %8 : vector<1x1x256xf32>
    %cst_8 = arith.constant 1.000000e+00 : f32
    %10 = vector.broadcast %cst_8 : f32 to vector<1x1x256xf32>
    %11 = arith.addf %10, %9 : vector<1x1x256xf32>
    %12 = arith.divf %10, %11 : vector<1x1x256xf32>
    %c0_9 = arith.constant 0 : index
    %c0_10 = arith.constant 0 : index
    %c0_11 = arith.constant 0 : index
    %13 = vector.load %arg8[%c0_9, %c0_10, %c0_11] : memref<1x1x8xf32, #tpu.memory_space<vmem>>, vector<1x1x8xf32>
    "tpu.trace_start"() <{level = 10 : i32, message = "bkh,bch->bkc"}> : () -> ()
    %cst_12 = arith.constant dense<0.000000e+00> : vector<1x1x8xf32>
    %14 = tpu.matmul %12, %0, %cst_12 {dimension_numbers = #tpu.dot_dimension_numbers<[2], [2], [1], [1], [0, 0, 0, 1, 1, 1], [0], [0]>} : vector<1x1x256xf32>, vector<1x8x256xf32>, vector<1x1x8xf32> -> vector<1x1x8xf32>
    "tpu.trace_stop"() : () -> ()
    %15 = arith.addf %13, %14 : vector<1x1x8xf32>
    %c0_13 = arith.constant 0 : index
    %c0_14 = arith.constant 0 : index
    %c0_15 = arith.constant 0 : index
    %16 = vector.load %arg8[%c0_13, %c0_14, %c0_15] : memref<1x1x8xf32, #tpu.memory_space<vmem>>, vector<1x1x8xf32>
    tpu.vector_store %arg8[%c0_13, %c0_14, %c0_15], %15 {strides = array<i32>} : memref<1x1x8xf32, #tpu.memory_space<vmem>>, vector<1x1x8xf32>,
    %c0_i32_16 = arith.constant 0 : i32
    %17 = arith.cmpi eq, %arg1, %c0_i32_16 : i32
    %18 = arith.extui %17 : i1 to i32
    %c0_i32_17 = arith.constant 0 : i32
    %19 = arith.cmpi ne, %18, %c0_i32_17 : i32
    scf.if %19 {
      %c0_18 = arith.constant 0 : index
      %c0_19 = arith.constant 0 : index
      %c0_20 = arith.constant 0 : index
      %20 = vector.load %arg8[%c0_18, %c0_19, %c0_20] : memref<1x1x8xf32, #tpu.memory_space<vmem>>, vector<1x1x8xf32>
      %cst_21 = arith.constant 3.906250e-03 : f32
      %21 = vector.broadcast %cst_21 : f32 to vector<1x1x8xf32>
      %22 = arith.mulf %20, %21 : vector<1x1x8xf32>
      %c0_22 = arith.constant 0 : index
      %c0_23 = arith.constant 0 : index
      %c0_24 = arith.constant 0 : index
      %23 = vector.load %arg5[%c0_22, %c0_23, %c0_24] : memref<1x1x8xf32, #tpu.memory_space<vmem>>, vector<1x1x8xf32>
      tpu.vector_store %arg5[%c0_22, %c0_23, %c0_24], %22 {strides = array<i32>} : memref<1x1x8xf32, #tpu.memory_space<vmem>>, vector<1x1x8xf32>,
    } else {
    }
    return
  }
  func.func @transform_0(%arg0: i32, %arg1: i32) -> (i32, i32) {
    %c0_i32 = arith.constant 0 : i32
    %c0_i32_0 = arith.constant 0 : i32
    %c0_i32_1 = arith.constant 0 : i32
    return %c0_i32, %c0_i32_0 : i32, i32
  }
  func.func @transform_1(%arg0: i32, %arg1: i32) -> (i32, i32, i32) {
    %c0_i32 = arith.constant 0 : i32
    %c0_i32_0 = arith.constant 0 : i32
    return %arg0, %c0_i32, %arg1 : i32, i32, i32
  }
  func.func @transform_2(%arg0: i32, %arg1: i32) -> (i32, i32, i32) {
    %c0_i32 = arith.constant 0 : i32
    %c0_i32_0 = arith.constant 0 : i32
    return %arg0, %c0_i32, %arg1 : i32, i32, i32
  }
  func.func @transform_3(%arg0: i32, %arg1: i32) -> (i32, i32, i32) {
    %c0_i32 = arith.constant 0 : i32
    %c0_i32_0 = arith.constant 0 : i32
    %c0_i32_1 = arith.constant 0 : i32
    return %arg0, %c0_i32, %c0_i32_0 : i32, i32, i32
  }
}

</mosaic_0001>

<bundles_post_ra>
// kernel: tpu_custom_call.1
= control target key start
LH: loop header
LB: loop body
LE: loop exit
PB: predicated region body
PF: predicated region fallthrough
CT: control target
= control target key end

     0   :  { %9 = vsyncpa [#allocation6], 0  ;;  %s1147_s0 = inlined_call_operand.hbm [shape: f32[1,8], index: 0, kind: input, shape index: {}]   ;;  %s1148_s1 = inlined_call_operand.hbm [shape: f32[2,8,256], index: 1, kind: input, shape index: {}]   ;;  %s1149_s2 = inlined_call_operand.hbm [shape: f32[2,1,256], index: 2, kind: output, shape index: {0}]   ;;  %s1150_s3 = inlined_call_operand.hbm [shape: f32[2,1,8], index: 3, kind: output, shape index: {1}]  }
   0x1   :  { %10 = vsyncpa [#allocation9], 0 }
   0x2   :  { %12 = vsyncpa [#allocation9 + $0x1], 0 }
   0x3   :  { %13 = vsyncpa [#allocation7], 0 }
   0x4   :  { %15 = vsyncpa [#allocation7 + $0x1], 0 }
   0x5   :  { %16 = vsyncpa [#allocation12], 0 }
   0x6   :  { %18 = vsyncpa [#allocation12 + $0x1], 0  ;;  %s902_s12 = smov 0   ;;  %s904_s13 = smov 0  }
   0x7   :  { %s906_s14 = smov 0   ;;  %s908_s15 = smov 0  }
   0x8   :  { %s910_s16 = smov 0   ;;  %s912_s17 = smov 0  }
   0x9 LB: > { %s587_s18 = sadd.s32 4294967295, %s874_s17   ;;  %s588_s19 = sadd.s32 4294967294, %s874_s17   ;;  %s874_s17 = sphi %s912_s17, %s24_s17   ;;  %s870_s16 = sphi %s910_s16, %s1175_s16   ;;  %s866_s15 = sphi %s908_s15, %s1174_s15   ;;  %s862_s14 = sphi %s906_s14, %s1173_s14   ;;  %s858_s13 = sphi %s904_s13, %s1172_s13   ;;  %s854_s12 = sphi %s902_s12, %s1171_s12  }
   0xa   : > { %p79_p0 = scmp.ne.s32.totalorder %s858_s13, %s854_s12  ;;  %p936_p1 = scmp.eq.s32.totalorder %s587_s18, 0 }
   0xb   : > { %p940_p2 = scmp.eq.s32.totalorder %s587_s18, 1  ;;  %p111_p3 = scmp.eq.s32.totalorder %s588_s19, 1 }
   0xc   : > { %s1155_s20 = scalar_select %p936_p1, 1, 0 }
   0xd   : > { %s1156_s21 = scalar_select %p940_p2, 1, 0 }
   0xe   : > { %p946_p4 = por %p936_p1, %p79_p0  ;;  %p589_p5 = scmp.ge.s32.totalorder %s874_s17, 1 }
   0xf   : > { %p951_p6 = por %p111_p3, %p79_p0  ;;  %p144_p7 = scmp.lt.s32.totalorder %s874_s17, 3 }
  0x10   : > { %s1157_s22 = scalar_select %p946_p4, 1, 0 }
  0x11   : > { %s1158_s23 = scalar_select %p951_p6, 1, 0 }
  0x12   : > { %p956_p8 = pnand %p589_p5, %p144_p7  ;;  %s876_s25 = smov [#allocation5]  }
  0x13   : > { %s157_s26 = sshll.u32 %s876_s25, 4  ;;  %s36_s28 = sadd.s32 1, %s870_s16  ;;  %s158_s26 = int_to_ptr.vmem [resolvable:$true] %s157_s26 }
  0x14   : > { %s1159_s24 = scalar_select %p956_p8, 1, 0 }
  0x15   : > { %p620_p10 = pneg %p956_p8  ;;  %s66_s29 = sadd.s32 1, %s862_s14 }
  0x16   : > { %p971_p12 = scmp.ge.s32.totalorder %s36_s28, 2  ;;  %s698_s6 = scalar_lea.hbm %s1147_s0, 16 }
  0x17   : > { %p965_p11 = pnand %p620_p10, %p936_p1  ;;  %p699_p13 = scmp.ne.s32.totalorder %s1147_s0, %s698_s6 }
  0x18   : > { %s1161_s30 = scalar_select %p971_p12, 1, 0 }
  0x19   : > { %p700_p0 = pneg %p965_p11  ;;  %p705_p7 = scmp.lt.u32.totalorder %s698_s6, %s1147_s0 }
  0x1b   : > { %p701_p3 = pnand %p700_p0, %p699_p13 }
  0x1d   : > { %p702_p5 = pneg %p701_p3 }
  0x1f   : > { %p707_p10 = pnand %p705_p7, %p702_p5 }
  0x21   : > { %710 = shalt.err (!%p707_p10)
}
  0x22   : > { %s711_s11 = scalar_lea.vmem %s158_s26, 16  ;;  %s718_s18 = scalar_lea.vmem %s158_s26, 32 }
  0x23   : > { %p712_p9 = scmp.ne.s32.totalorder %s158_s26, %s711_s11  ;;  %p719_p1 = scmp.lt.s32.totalorder %s158_s26, %s158_s26 }
  0x24   : > { %p720_p8 = scmp.lt.s32.totalorder %s718_s18, %s711_s11 }
  0x25   : > { %p714_p6 = pnand %p712_p9, %p700_p0 }
  0x26   : > { %p721_p2 = por %p720_p8, %p719_p1 }
  0x27   : > { %p715_p4 = pneg %p714_p6 }
  0x29   : > { %p722_p12 = pnand %p721_p2, %p715_p4 }
  0x2b   : > { %725 = shalt.err (!%p722_p12)
}
  0x2c   : > { %623 = dma.hbm_to_vmem [thread:$0]  (!%p965_p11), %s1147_s0, 16, %s158_s26, [#allocation6]  }
  0x2d   : > { %p1162_p1 = scmp.ne.s32.totalorder %s1161_s30, 0  ;;  %p73_p2 = scmp.ne.s32.totalorder %s862_s14, %s858_s13 }
  0x2e   : > { %p74_p4 = scmp.eq.s32.totalorder %s874_s17, 0  ;;  %p636_p6 = scmp.lt.s32.totalorder %s874_s17, 2 }
  0x2f   : > { %s1177_s28 = smov (%p1162_p1, %s36_s28), 0  ;;  %p1163_p12 = scmp.ne.s32.totalorder %s1156_s21, 0 }
  0x30   : > { %s61_s27 = ssub.s32 %s870_s16, %s1177_s28  ;;  %p75_p9 = por %p74_p4, %p73_p2 }
  0x31   : > { %p64_p8 = scmp.eq.s32.totalorder %s61_s27, 0  ;;  %p1003_p13 = por %p1163_p12, %p73_p2 }
  0x32   : > { %s168_s5 = sand.u32 1, %s862_s14   ;;  %s608_s30 = sshll.u32 %s870_s16, 8 }
  0x33   : > { %s1011_s6 = scalar_select %p64_p8, %s862_s14, %s66_s29  }
  0x34   : > { %s592_s26 = sshll.u32 %s168_s5, 4  ;;  %s1017_s9 = scalar_lea.hbm %s1148_s1, %s608_s30 }
  0x35   : > { %s172_s21 = scalar_lea.vmem [#allocation8], %s592_s26  ;;  %p1021_p11 = pnand %p636_p6, %p75_p9 }
  0x36   : > { %s182_s10 = sshll.u32 %s172_s21, 4  ;;  %s169_s29 = scalar_lea.sflag [#allocation9], %s168_s5  ;;  %s1019_s10 = int_to_ptr.vmem [resolvable:$true] %s182_s10 }
  0x37   : > { %s726_s18 = scalar_lea.hbm %s1017_s9, 256  ;;  %p728_p3 = pneg %p1021_p11 }
  0x38   : > { %p727_p0 = scmp.ne.s32.totalorder %s1017_s9, %s726_s18  ;;  %s731_s27 = scalar_lea.hbm %s1148_s1, 512 }
  0x39   : > { %p732_p10 = scmp.lt.u32.totalorder %s1017_s9, %s1148_s1  ;;  %p733_p1 = scmp.lt.u32.totalorder %s731_s27, %s726_s18 }
  0x3a   : > { %p729_p5 = pnand %p728_p3, %p727_p0  ;;  %p735_p4 = scmp.lt.u32.totalorder %s726_s18, %s1017_s9 }
  0x3b   : > { %p734_p2 = por %p733_p1, %p732_p10 }
  0x3c   : > { %p730_p7 = pneg %p729_p5 }
  0x3d   : > { %p736_p6 = por %p735_p4, %p734_p2 }
  0x3f   : > { %p737_p8 = pnand %p736_p6, %p730_p7 }
  0x41   : > { %740 = shalt.err (!%p737_p8)
}
  0x42   : > { %s741_s5 = scalar_lea.vmem %s1019_s10, 256  ;;  %s877_s7 = smov [#allocation8]  }
  0x43   : > { %p742_p9 = scmp.ne.s32.totalorder %s1019_s10, %s741_s5  ;;  %s746_s8 = sshll.u32 %s877_s7, 4  ;;  %s747_s8 = int_to_ptr.vmem [resolvable:$false] %s746_s8 }
  0x44   : > { %s748_s21 = scalar_lea.vmem %s747_s8, 512  ;;  %p749_p5 = scmp.lt.s32.totalorder %s1019_s10, %s747_s8 }
  0x45   : > { %p744_p12 = pnand %p742_p9, %p728_p3  ;;  %p750_p10 = scmp.lt.s32.totalorder %s748_s21, %s741_s5 }
  0x47   : > { %p745_p0 = pneg %p744_p12  ;;  %p751_p1 = por %p750_p10, %p749_p5 }
  0x49   : > { %p752_p2 = pnand %p751_p1, %p745_p0 }
  0x4b   : > { %755 = shalt.err (!%p752_p2)
}
  0x4c   : > { %627 = dma.hbm_to_vmem [thread:$0]  (!%p1021_p11), %s1017_s9, 256, %s1019_s10, %s169_s29  }
  0x4d   : > { %p1166_p7 = scmp.ne.s32.totalorder %s1159_s24, 0 }
  0x4e   : > { %p1167_p3 = scmp.ne.s32.totalorder (!%p1166_p7), %s1155_s20, 0 }
  0x4f   : > { %191 = sbr.rel (%p1166_p7) target bundleno = 572 (0x23c), region = 28 }
  0x56   : > { %837 = dma.done.wait (%p1167_p3), [#allocation6], 16  }
  0x57   : > { %839 = vsyncadd (%p1167_p3), [#allocation6], 4294967280  ;;  %s1057_s18 = sand.u32 1, %s858_s13   ;;  %p1168_p4 = scmp.ne.s32.totalorder %s1157_s22, 0 }
  0x58   : > { %s597_s19 = sshll.u32 %s1057_s18, 4  ;;  %s198_s11 = scalar_lea.sflag [#allocation9], %s1057_s18 }
  0x59   : > { %s201_s25 = scalar_lea.vmem [#allocation8], %s597_s19 }
  0x5a   : > { %841 = dma.done.wait (%p1168_p4), %s198_s11, 256  }
  0x5b   : > { %843 = vsyncadd (%p1168_p4), %s198_s11, 4294967040  ;;  %vm335_vm0 = vcmask 57344   ;;  %v878_v0 = vmov 0.0   ;;  %v231_v1 = vld [vmem:[%s201_s25 + $0x8] sm:$0xff]  ;;  %v230_v2 = vld [vmem:[%s201_s25] sm:$0xff]  ;;  %vm233_vm1 = vcmask 64512   ;;  %v314_v6 = vlaneseq }
  0x5c   : > { %301 = vmatprep.mubr.f32.mxu0 %v878_v0  ;;  %336 = vst.msk [vmem:[#allocation4] sm:$0x1] %vm335_vm0, %v878_v0  ;;  %v232_v3 = vld [vmem:[#allocation5] sm:$0x1]  ;;  %237 = vmatprep.subr.mxu0 %v231_v1  ;;  %v879_v4 = vmov 1966171168  }
  0x5d   : > { %350 = vmatprep.subr.mxu1 %v231_v1  ;;  %238 = vmatpush1.msra.mxu0 %v230_v2  ;;  %v312_v5 = vunpack.c.l.s4 %v879_v4  ;;  %v315_v8 = vshrl.u32 %v314_v6, 7  ;;  %s598_s20 = sshll.u32 %s1057_s18, 1  ;;  %vm328_vm2 = vcmp.lt.s32.totalorder %v314_v6, 256  ;;  %s609_s24 = sshll.u32 %s866_s15, 5 }
  0x5e   : > { %351 = vmatpush1.xpose.msra.mxu1 %v230_v2  ;;  %599 = vmatmul.mubr.msk.f32.vlgmr.msra.gmra.mrb[0].mxu0 %vm233_vm1, %v232_v3  ;;  %s221_s22 = scalar_lea.vmem [#allocation10], %s598_s20  ;;  %s1071_s29 = scalar_lea.hbm %s1149_s2, %s609_s24 }
  0x5f   : > { %v313_v7 = vunpack.c.0.s8 %v312_v5  ;;  %s450_s27 = sshll.u32 %s221_s22, 4  ;;  %s430_s26 = scalar_lea.sflag [#allocation7], %s1057_s18  ;;  %s451_s27 = int_to_ptr.vmem [resolvable:$true] %s450_s27 }
  0x60   : > { %s756_s30 = scalar_lea.vmem %s451_s27, 32  ;;  %s880_s5 = smov [#allocation10]  }
  0x61   : > { %v316_v10 = vsub.s32 %v313_v7, %v315_v8  ;;  %p757_p11 = scmp.ne.s32.totalorder %s451_s27, %s756_s30  ;;  %s760_s7 = sshll.u32 %s880_s5, 4  ;;  %s761_s7 = int_to_ptr.vmem [resolvable:$false] %s760_s7 }
  0x62   : > { %s762_s8 = scalar_lea.vmem %s761_s7, 64  ;;  %p763_p9 = scmp.lt.s32.totalorder %s451_s27, %s761_s7 }
  0x63   : > { %p758_p6 = pnand %p757_p11, %p1003_p13  ;;  %p764_p12 = scmp.lt.s32.totalorder %s762_s8, %s756_s30 }
  0x65   : > { %p759_p8 = pneg %p758_p6  ;;  %p765_p0 = por %p764_p12, %p763_p9 }
  0x67   : > { %p766_p5 = pnand %p765_p0, %p759_p8 }
 0x131   : > { %v303_v9 = vpop.f32.mrb[0].mxu0 }
 0x132   : > { %v600_v11 = vmul.f32 -1.442695, %v303_v9  ;;  %v305_v12 = vpop.f32.mrb[1].mxu0 }
 0x133   : > { %v310_v13 = vcombine.low %v303_v9, %v305_v12  ;;  %v601_v14 = vmul.f32 -1.442695, %v305_v12 }
 0x134   : > { %690 = vpow2.f32 %v600_v11 }
 0x135   : > { %v317_v15 = vrot.slane %v310_v13, %v316_v10  ;;  %692 = vpow2.f32 %v601_v14 }
 0x137   : > { %v324_v16 = vrot.slane %v317_v15, %v316_v10 }
 0x139   : > { %330 = vst.msk [vmem:[%s221_s22] sm:$0x3] %vm328_vm2, %v324_v16 }
 0x13e   : > { %v691_v17 = vpop.eup %690 }
 0x13f   : > { %v693_v18 = vpop.eup %692  ;;  %v343_v19 = vadd.f32 1.0, %v691_v17 }
 0x140   : > { %v344_v20 = vadd.f32 1.0, %v693_v18 }
 0x142   : > { %694 = vrcp.f32 %v344_v20 }
 0x143   : > { %696 = vrcp.f32 %v343_v19 }
 0x14c   : > { %v695_v21 = vpop.eup %694 }
 0x14d   : > { %v697_v22 = vpop.eup %696  ;;  %414 = vmatprep.mubr.f32.mxu1 %v695_v21 }
 0x14e   : > { %415 = vmatmul.mubr.f32.vlgmr.msra.gmra.mrb[0].mxu1 %v697_v22 }
 0x14f   : > { %769 = shalt.err (!%p766_p5)
}
 0x150   : > { %s770_s21 = scalar_lea.hbm %s1071_s29, 32  ;;  %s774_s25 = scalar_lea.hbm %s1149_s2, 64 }
 0x151   : > { %p771_p10 = scmp.ne.s32.totalorder %s1071_s29, %s770_s21  ;;  %p775_p7 = scmp.lt.u32.totalorder %s1071_s29, %s1149_s2 }
 0x152   : > { %p776_p3 = scmp.lt.u32.totalorder %s774_s25, %s770_s21  ;;  %p778_p11 = scmp.lt.u32.totalorder %s770_s21, %s1071_s29 }
 0x153   : > { %p772_p1 = pnand %p771_p10, %p1003_p13 }
 0x154   : > { %p777_p4 = por %p776_p3, %p775_p7 }
 0x155   : > { %p773_p2 = pneg %p772_p1 }
 0x156   : > { %p779_p6 = por %p778_p11, %p777_p4 }
 0x158   : > { %p780_p8 = pnand %p779_p6, %p773_p2 }
 0x15a   : > { %783 = shalt.err (!%p780_p8)
}
 0x15b   : > { %616 = dma.vmem_to_hbm [thread:$0]  (%p1003_p13), %s451_s27, 32, %s1071_s29, %s430_s26   ;;  %v349_v23 = vld [vmem:[#allocation4] sm:$0x1] }
 0x15c   : > { %s605_s24 = sshll.u32 %s866_s15, 4  ;;  %s227_s9 = scalar_lea.vmem [#allocation11], %s1057_s18 }
 0x15d   : > { %s463_s10 = sshll.u32 %s227_s9, 4  ;;  %s1097_s7 = scalar_lea.hbm %s1150_s3, %s605_s24  ;;  %s1099_s10 = int_to_ptr.vmem [resolvable:$true] %s463_s10 }
 0x15e   : > { %s435_s29 = scalar_lea.sflag [#allocation12], %s1057_s18  ;;  %s784_s27 = scalar_lea.vmem %s1099_s10, 16 }
 0x15f   : > { %p785_p9 = scmp.ne.s32.totalorder %s1099_s10, %s784_s27  ;;  %s881_s15 = smov [#allocation11]  }
 0x160   : > { %s788_s26 = sshll.u32 %s881_s15, 4  ;;  %s789_s26 = int_to_ptr.vmem [resolvable:$false] %s788_s26 }
 0x161   : > { %p786_p12 = pnand %p785_p9, %p1003_p13  ;;  %s790_s8 = scalar_lea.vmem %s789_s26, 32 }
 0x162   : > { %p791_p5 = scmp.lt.s32.totalorder %s1099_s10, %s789_s26  ;;  %p792_p10 = scmp.lt.s32.totalorder %s790_s8, %s784_s27 }
 0x163   : > { %p787_p0 = pneg %p786_p12 }
 0x164   : > { %p793_p1 = por %p792_p10, %p791_p5 }
 0x166   : > { %p794_p2 = pnand %p793_p1, %p787_p0 }
 0x221   : > { %v416_v24 = vpop.f32.mrb[0].mxu1 }
 0x222   : > { %v420_v25 = vadd.f32 %v416_v24, %v349_v23  ;;  %v418_v26 = vpop.f32.mrb[1].mxu1 }
 0x224   : > { %422 = vst.msk [vmem:[#allocation4] sm:$0x1] %vm335_vm0, %v420_v25 }
 0x22b   : > { %v426_v27 = vld [vmem:[#allocation4] sm:$0x1] }
 0x22c   : > { %v427_v28 = vmul.f32 0.00390625, %v426_v27 }
 0x22e   : > { %428 = vst.msk [vmem:[%s227_s9] sm:$0x1] %vm335_vm0, %v427_v28 }
 0x22f   : > { %797 = shalt.err (!%p794_p2)
}
 0x230   : > { %s798_s18 = scalar_lea.hbm %s1097_s7, 16  ;;  %s802_s11 = scalar_lea.hbm %s1150_s3, 32 }
 0x231   : > { %p799_p7 = scmp.ne.s32.totalorder %s1097_s7, %s798_s18  ;;  %p803_p11 = scmp.lt.u32.totalorder %s1097_s7, %s1150_s3 }
 0x232   : > { %p804_p6 = scmp.lt.u32.totalorder %s802_s11, %s798_s18  ;;  %p806_p9 = scmp.lt.u32.totalorder %s798_s18, %s1097_s7 }
 0x233   : > { %p800_p3 = pnand %p799_p7, %p1003_p13 }
 0x234   : > { %p805_p8 = por %p804_p6, %p803_p11 }
 0x235   : > { %p801_p4 = pneg %p800_p3 }
 0x236   : > { %p807_p12 = por %p806_p9, %p805_p8 }
 0x238   : > { %p808_p0 = pnand %p807_p12, %p801_p4 }
 0x23a   : > { %811 = shalt.err (!%p808_p0)
}
 0x23b   : > { %617 = dma.vmem_to_hbm [thread:$0]  (%p1003_p13), %s1099_s10, 16, %s1097_s7, %s435_s29  }
 0x23c PF: > { %s475_s22 = sand.u32 1, %s854_s12   ;;  %p1169_p5 = scmp.ne.s32.totalorder %s1158_s23, 0 }
 0x23d   : > { %p1170_p10 = scmp.ge.s32.totalorder %s874_s17, 2  ;;  %s476_s24 = scalar_lea.sflag [#allocation7], %s475_s22 }
 0x23f   : > { %p629_p1 = pnand %p1170_p10, %p1169_p5 }
 0x241   : > { %845 = dma.done.wait (!%p629_p1), %s476_s24, 32  }
 0x242   : > { %847 = vsyncadd (!%p629_p1), %s476_s24, 4294967264  ;;  %s485_s9 = scalar_lea.sflag [#allocation12], %s475_s22 }
 0x243   : > { %849 = dma.done.wait (!%p629_p1), %s485_s9, 16  }
 0x244   : > { %851 = vsyncadd (!%p629_p1), %s485_s9, 4294967280  ;;  %s24_s17 = sadd.s32 1, %s874_s17   ;;  %s1171_s12 = smov %s858_s13 }
 0x245   : > { %p21_p2 = scmp.ge.s32.totalorder %s24_s17, 4   ;;  %s1172_s13 = smov %s862_s14 }
 0x246   : > { %s1173_s14 = smov %s1011_s6  ;;  %s1174_s15 = smov %s870_s16 }
 0x247   : > { %s1175_s16 = smov %s1177_s28  ;;  %23 = sbr.rel (!%p21_p2) target bundleno = 9 (0x9), region = 103 }
 0x24e   :  { %489 = vsyncpa [#allocation6], 1 }
 0x24f   :  { %491 = vsyncpa [#allocation6 + $0x1], 1 }
 0x250   :  { %492 = vsyncpa [#allocation9], 1 }
 0x251   :  { %494 = vsyncpa [#allocation9 + $0x1], 1 }
 0x252   :  { %495 = vsyncpa [#allocation7], 1 }
 0x253   :  { %497 = vsyncpa [#allocation7 + $0x1], 1 }
 0x254   :  { %498 = vsyncpa [#allocation12], 1 }
 0x255   :  { %500 = vsyncpa [#allocation12 + $0x1], 1 }

</bundles_post_ra>
